<compile_context>
chip_gen: v6e
topology: v6e:2x2x1
jax: 0.10.0
libtpu: 0.0.40
codegen_flags: <defaults>
</compile_context>

<pallas_src>
import functools

import jax
import jax.numpy as jnp
from jax.experimental import pallas as pl
from jax.experimental.pallas import tpu as pltpu

LN_EPS = 1e-5   # PyTorch nn.LayerNorm default eps
LANE = 128      # TPU lane width
VROWS = 8       # packed vector buffer rows (b1,g1,be1,b2,g2,be2,b3,pad)


def _round_up(x, m):
    return ((x + m - 1) // m) * m


def _layernorm(h, gamma, beta, n_valid):
    """Two-pass LayerNorm over the first `n_valid` lanes of lane-padded `h`.

    Padded lanes of `h` are exactly zero, so the full-width sum gives the true
    mean.  Centered values on padded lanes equal -mean, so the variance sum is
    lane-masked.  gamma/beta are zero on padded lanes, hence the output stays
    exactly zero there (required so the next matmul sees clean zeros).
    """
    inv_n = 1.0 / float(n_valid)
    mean = jnp.sum(h, axis=-1, keepdims=True) * inv_n
    centered = h - mean
    lane = jax.lax.broadcasted_iota(jnp.int32, (1, LANE), 1)
    cm = jnp.where(lane < n_valid, centered, 0.0)
    var = jnp.sum(cm * cm, axis=-1, keepdims=True) * inv_n
    return centered * jax.lax.rsqrt(var + LN_EPS) * gamma + beta


def actor_kernel(x_ref, w_ref, v_ref, out_ref, *,
                 n_states, ns_pad, n_hid1, n_hid2, n_actions):
    x = x_ref[...].astype(jnp.float32)                    # [bb, n_states]

    # Static slices into the packed weight buffer (lane width 128).
    w1 = w_ref[0:n_states, :]                             # [n_states, 128]
    w2 = w_ref[ns_pad:ns_pad + LANE, :]                   # [128, 128]
    w3 = w_ref[ns_pad + LANE:ns_pad + 2 * LANE, :]        # [128, 128]

    # Packed vectors: one row each, broadcast over the batch block.
    b1, g1, be1 = v_ref[0:1, :], v_ref[1:2, :], v_ref[2:3, :]
    b2, g2, be2 = v_ref[3:4, :], v_ref[4:5, :], v_ref[5:6, :]
    b3 = v_ref[6:7, :]

    # fc1 -> LayerNorm -> relu  (padded lanes stay exactly zero throughout)
    h = jnp.dot(x, w1, preferred_element_type=jnp.float32) + b1
    h = jnp.maximum(_layernorm(h, g1, be1, n_hid1), 0.0)

    # fc2 -> LayerNorm -> relu
    h = jnp.dot(h, w2, preferred_element_type=jnp.float32) + b2
    h = jnp.maximum(_layernorm(h, g2, be2, n_hid2), 0.0)

    # mu -> tanh; only the n_actions lanes that go to HBM are computed/stored.
    mu = jnp.dot(h, w3, preferred_element_type=jnp.float32) + b3   # [bb, 128]
    out_ref[...] = jnp.tanh(mu[:, 0:n_actions]).astype(out_ref.dtype)


def make_actor_forward(n_states, n_actions, n_hid1, n_hid2,
                       block_b=512, vmem_limit_bytes=32 * 1024 * 1024,
                       core_parallel=False):
    """Build a jitted forward(state, wbuf, vbuf) for packed actor params."""
    assert n_hid1 <= LANE and n_hid2 <= LANE and n_actions <= LANE
    ns_pad = _round_up(max(n_states, 1), 8)
    w_rows = ns_pad + 2 * LANE

    kernel = functools.partial(
        actor_kernel, n_states=n_states, ns_pad=ns_pad,
        n_hid1=n_hid1, n_hid2=n_hid2, n_actions=n_actions)

    # pltpu.CORE_PARALLEL splits the batch grid across both TensorCores on
    # v7x; plain "parallel" is the portable default (v5e/v6e are single-TC).
    batch_sem = pltpu.CORE_PARALLEL if core_parallel else "parallel"

    @jax.jit
    def forward(state, wbuf, vbuf):
        B = state.shape[0]
        # Clamp the block to the 8-aligned batch: tiny batches do no extra
        # work; large batches use the full block so the ~0.35 us per-grid-step
        # pipeline overhead is amortized over many rows.
        bb = min(block_b, _round_up(max(B, 1), 8))
        grid = (pl.cdiv(B, bb),)

        out = pl.pallas_call(
            kernel,
            out_shape=jax.ShapeDtypeStruct((B, n_actions), jnp.float32),
            grid_spec=pltpu.PrefetchScalarGridSpec(
                num_scalar_prefetch=0,
                grid=grid,
                in_specs=[
                    # State fed directly (no wrapper pad/copy); the last
                    # partial block's OOB rows are garbage, but rows are
                    # independent and OOB output rows are discarded.
                    pl.BlockSpec((bb, n_states), lambda i: (i, 0)),
                    # Packed weights / vectors stay VMEM-resident across the
                    # grid (constant index_map -> fetched once).
                    pl.BlockSpec((w_rows, LANE), lambda i: (0, 0)),
                    pl.BlockSpec((VROWS, LANE), lambda i: (0, 0)),
                ],
                out_specs=pl.BlockSpec((bb, n_actions), lambda i: (i, 0)),
            ),
            compiler_params=pltpu.CompilerParams(
                dimension_semantics=(batch_sem,),
                vmem_limit_bytes=vmem_limit_bytes,
            ),
        )(state.astype(jnp.float32), wbuf, vbuf)
        return out

    return forward


def init_actor_params(key, n_states, n_actions, n_hid1, n_hid2):
    """Deterministic init matching the PyTorch module's uniform bounds.

    PyTorch: f1 = 1/sqrt(fc1.weight.size()[0]) = 1/sqrt(n_hid1)
             f2 = 1/sqrt(fc2.weight.size()[0]) = 1/sqrt(n_hid2)
             f3 = 0.003
    LayerNorm params: gamma=1, beta=0.
    Weights are stored transposed ([n_in, n_out]) for the kernel.
    """
    ks = jax.random.split(key, 6)
    f1 = 1.0 / float(n_hid1) ** 0.5
    f2 = 1.0 / float(n_hid2) ** 0.5
    f3 = 0.003

    w1 = jax.random.uniform(ks[0], (n_states, n_hid1), jnp.float32, -f1, f1)
    b1 = jax.random.uniform(ks[1], (n_hid1,), jnp.float32, -f1, f1)
    g1 = jnp.ones((n_hid1,), jnp.float32)
    be1 = jnp.zeros((n_hid1,), jnp.float32)

    w2 = jax.random.uniform(ks[2], (n_hid1, n_hid2), jnp.float32, -f2, f2)
    b2 = jax.random.uniform(ks[3], (n_hid2,), jnp.float32, -f2, f2)
    g2 = jnp.ones((n_hid2,), jnp.float32)
    be2 = jnp.zeros((n_hid2,), jnp.float32)

    w3 = jax.random.uniform(ks[4], (n_hid2, n_actions), jnp.float32, -f3, f3)
    b3 = jax.random.uniform(ks[5], (n_actions,), jnp.float32, -f3, f3)

    return (w1, b1, g1, be1, w2, b2, g2, be2, w3, b3)


def pack_actor_params(params, n_states, n_actions, n_hid1, n_hid2):
    """Pack 10 small parameter tensors into two lane-padded buffers (once)."""
    (w1, b1, g1, be1, w2, b2, g2, be2, w3, b3) = params
    ns_pad = _round_up(max(n_states, 1), 8)

    wbuf = jnp.zeros((ns_pad + 2 * LANE, LANE), jnp.float32)
    wbuf = wbuf.at[:n_states, :n_hid1].set(w1)
    wbuf = wbuf.at[ns_pad:ns_pad + n_hid1, :n_hid2].set(w2)
    wbuf = wbuf.at[ns_pad + LANE:ns_pad + LANE + n_hid2, :n_actions].set(w3)

    vbuf = jnp.zeros((VROWS, LANE), jnp.float32)
    vbuf = vbuf.at[0, :n_hid1].set(b1)
    vbuf = vbuf.at[1, :n_hid1].set(g1)
    vbuf = vbuf.at[2, :n_hid1].set(be1)
    vbuf = vbuf.at[3, :n_hid2].set(b2)
    vbuf = vbuf.at[4, :n_hid2].set(g2)
    vbuf = vbuf.at[5, :n_hid2].set(be2)
    vbuf = vbuf.at[6, :n_actions].set(b3)
    return wbuf, vbuf


def actor_forward_ref(state, params):
    """Pure-JAX reference for correctness checking (two-pass LayerNorm)."""
    (w1, b1, g1, be1, w2, b2, g2, be2, w3, b3) = params

    def ln(h, g, b):
        m = jnp.mean(h, axis=-1, keepdims=True)
        v = jnp.mean((h - m) ** 2, axis=-1, keepdims=True)
        return (h - m) / jnp.sqrt(v + LN_EPS) * g + b

    h = jax.nn.relu(ln(state @ w1 + b1, g1, be1))
    h = jax.nn.relu(ln(h @ w2 + b2, g2, be2))
    return jnp.tanh(h @ w3 + b3)


if __name__ == "__main__":
    # Small shapes consistent with the module's forward.
    B, n_states, n_actions, n_hid1, n_hid2 = 8, 16, 4, 64, 32

    key = jax.random.PRNGKey(0)
    k_params, k_state, k_mid, k_big = jax.random.split(key, 4)

    params = init_actor_params(k_params, n_states, n_actions, n_hid1, n_hid2)
    wbuf, vbuf = pack_actor_params(params, n_states, n_actions, n_hid1, n_hid2)
    forward = make_actor_forward(n_states, n_actions, n_hid1, n_hid2, block_b=512)

    # Small-batch check (single, clamped grid block).
    state = jax.random.normal(k_state, (B, n_states), jnp.float32)
    out = jax.block_until_ready(forward(state, wbuf, vbuf))
    ref = actor_forward_ref(state, params)
    assert out.shape == (B, n_actions), out.shape
    assert jnp.allclose(out, ref, atol=1e-5, rtol=1e-5), "mismatch (small batch)"

    # Non-multiple batch, single partial block.
    B2 = 300
    state2 = jax.random.normal(k_mid, (B2, n_states), jnp.float32)
    out2 = jax.block_until_ready(forward(state2, wbuf, vbuf))
    ref2 = actor_forward_ref(state2, params)
    assert out2.shape == (B2, n_actions), out2.shape
    assert jnp.allclose(out2, ref2, atol=1e-5, rtol=1e-5), "mismatch (medium batch)"

    # Multi-step grid with a partial (out-of-bounds-padded) final block.
    B3 = 1500
    state3 = jax.random.normal(k_big, (B3, n_states), jnp.float32)
    out3 = jax.block_until_ready(forward(state3, wbuf, vbuf))
    ref3 = actor_forward_ref(state3, params)
    assert out3.shape == (B3, n_actions), out3.shape
    assert jnp.allclose(out3, ref3, atol=1e-5, rtol=1e-5), "mismatch (large batch)"

    print("KERNEL_OK")
</pallas_src>

<mosaic_0001>
module attributes {stable_mosaic.version = 11 : i64} {
  func.func @actor_kernel(%arg0: i32, %arg1: memref<8x16xf32, #tpu.memory_space<vmem>>, %arg2: memref<272x128xf32, #tpu.memory_space<vmem>>, %arg3: memref<8x128xf32, #tpu.memory_space<vmem>>, %arg4: memref<8x4xf32, #tpu.memory_space<vmem>>) attributes {dimension_semantics = [#tpu.dimension_semantics<parallel>], iteration_bounds = array<i64: 1>, scalar_prefetch = 0 : i64, scratch_operands = 0 : i64, tpu.core_type = #tpu.core_type<tc>, window_params = [{transform_indices = @transform_0, window_bounds = array<i64: 8, 16>}, {pipeline_mode = #tpu.pipeline_mode<synchronous>, transform_indices = @transform_1, window_bounds = array<i64: 272, 128>}, {pipeline_mode = #tpu.pipeline_mode<synchronous>, transform_indices = @transform_2, window_bounds = array<i64: 8, 128>}, {transform_indices = @transform_3, window_bounds = array<i64: 8, 4>}]} {
    %c0 = arith.constant 0 : index
    %c0_0 = arith.constant 0 : index
    %0 = vector.load %arg1[%c0, %c0_0] : memref<8x16xf32, #tpu.memory_space<vmem>>, vector<8x16xf32>
    %c0_1 = arith.constant 0 : index
    %c0_2 = arith.constant 0 : index
    %1 = vector.load %arg2[%c0_1, %c0_2] : memref<272x128xf32, #tpu.memory_space<vmem>>, vector<16x128xf32>
    %c16 = arith.constant 16 : index
    %c0_3 = arith.constant 0 : index
    %2 = vector.load %arg2[%c16, %c0_3] : memref<272x128xf32, #tpu.memory_space<vmem>>, vector<128x128xf32>
    %c144 = arith.constant 144 : index
    %c0_4 = arith.constant 0 : index
    %3 = vector.load %arg2[%c144, %c0_4] : memref<272x128xf32, #tpu.memory_space<vmem>>, vector<128x128xf32>
    %c0_5 = arith.constant 0 : index
    %c0_6 = arith.constant 0 : index
    %4 = vector.load %arg3[%c0_5, %c0_6] : memref<8x128xf32, #tpu.memory_space<vmem>>, vector<1x128xf32>
    %c1 = arith.constant 1 : index
    %c0_7 = arith.constant 0 : index
    %5 = vector.load %arg3[%c1, %c0_7] : memref<8x128xf32, #tpu.memory_space<vmem>>, vector<1x128xf32>
    %c2 = arith.constant 2 : index
    %c0_8 = arith.constant 0 : index
    %6 = vector.load %arg3[%c2, %c0_8] : memref<8x128xf32, #tpu.memory_space<vmem>>, vector<1x128xf32>
    %c3 = arith.constant 3 : index
    %c0_9 = arith.constant 0 : index
    %7 = vector.load %arg3[%c3, %c0_9] : memref<8x128xf32, #tpu.memory_space<vmem>>, vector<1x128xf32>
    %c4 = arith.constant 4 : index
    %c0_10 = arith.constant 0 : index
    %8 = vector.load %arg3[%c4, %c0_10] : memref<8x128xf32, #tpu.memory_space<vmem>>, vector<1x128xf32>
    %c5 = arith.constant 5 : index
    %c0_11 = arith.constant 0 : index
    %9 = vector.load %arg3[%c5, %c0_11] : memref<8x128xf32, #tpu.memory_space<vmem>>, vector<1x128xf32>
    %c6 = arith.constant 6 : index
    %c0_12 = arith.constant 0 : index
    %10 = vector.load %arg3[%c6, %c0_12] : memref<8x128xf32, #tpu.memory_space<vmem>>, vector<1x128xf32>
    %cst = arith.constant dense<0.000000e+00> : vector<8x128xf32>
    %11 = tpu.matmul %0, %1, %cst {dimension_numbers = #tpu.dot_dimension_numbers<[1], [0], [0], [1], [0, 0, 1, 1], [], []>} : vector<8x16xf32>, vector<16x128xf32>, vector<8x128xf32> -> vector<8x128xf32>
    %12 = vector.broadcast %4 : vector<1x128xf32> to vector<8x128xf32>
    %13 = arith.addf %11, %12 : vector<8x128xf32>
    %cst_13 = arith.constant dense<0.000000e+00> : vector<8xf32>
    %14 = vector.multi_reduction <add>, %13, %cst_13 [1] : vector<8x128xf32> to vector<8xf32>
    %15 = vector.shape_cast %14 : vector<8xf32> to vector<8x1xf32>
    %cst_14 = arith.constant 1.562500e-02 : f32
    %16 = vector.broadcast %cst_14 : f32 to vector<8x1xf32>
    %17 = arith.mulf %15, %16 : vector<8x1xf32>
    %18 = vector.broadcast %17 : vector<8x1xf32> to vector<8x128xf32>
    %19 = arith.subf %13, %18 : vector<8x128xf32>
    %20 = tpu.iota {dimensions = array<i32: 1>} : vector<1x128xi32>
    %c64_i32 = arith.constant 64 : i32
    %21 = vector.broadcast %c64_i32 : i32 to vector<1x128xi32>
    %22 = arith.cmpi slt, %20, %21 : vector<1x128xi32>
    %cst_15 = arith.constant 0.000000e+00 : f32
    %23 = vector.shape_cast %22 : vector<1x128xi1> to vector<1x128xi1>
    %24 = vector.broadcast %23 : vector<1x128xi1> to vector<8x128xi1>
    %25 = vector.broadcast %cst_15 : f32 to vector<8x128xf32>
    %26 = arith.select %24, %19, %25 : vector<8x128xi1>, vector<8x128xf32>
    %27 = arith.mulf %26, %26 : vector<8x128xf32>
    %cst_16 = arith.constant dense<0.000000e+00> : vector<8xf32>
    %28 = vector.multi_reduction <add>, %27, %cst_16 [1] : vector<8x128xf32> to vector<8xf32>
    %29 = vector.shape_cast %28 : vector<8xf32> to vector<8x1xf32>
    %cst_17 = arith.constant 1.562500e-02 : f32
    %30 = vector.broadcast %cst_17 : f32 to vector<8x1xf32>
    %31 = arith.mulf %29, %30 : vector<8x1xf32>
    %cst_18 = arith.constant 9.99999974E-6 : f32
    %32 = vector.broadcast %cst_18 : f32 to vector<8x1xf32>
    %33 = arith.addf %31, %32 : vector<8x1xf32>
    %34 = math.rsqrt %33 : vector<8x1xf32>
    %35 = vector.broadcast %34 : vector<8x1xf32> to vector<8x128xf32>
    %36 = arith.mulf %19, %35 : vector<8x128xf32>
    %37 = vector.broadcast %5 : vector<1x128xf32> to vector<8x128xf32>
    %38 = arith.mulf %36, %37 : vector<8x128xf32>
    %39 = vector.broadcast %6 : vector<1x128xf32> to vector<8x128xf32>
    %40 = arith.addf %38, %39 : vector<8x128xf32>
    %cst_19 = arith.constant 0.000000e+00 : f32
    %41 = vector.broadcast %cst_19 : f32 to vector<8x128xf32>
    %42 = arith.maximumf %40, %41 : vector<8x128xf32>
    %cst_20 = arith.constant dense<0.000000e+00> : vector<8x128xf32>
    %43 = tpu.matmul %42, %2, %cst_20 {dimension_numbers = #tpu.dot_dimension_numbers<[1], [0], [0], [1], [0, 0, 1, 1], [], []>} : vector<8x128xf32>, vector<128x128xf32>, vector<8x128xf32> -> vector<8x128xf32>
    %44 = vector.broadcast %7 : vector<1x128xf32> to vector<8x128xf32>
    %45 = arith.addf %43, %44 : vector<8x128xf32>
    %cst_21 = arith.constant dense<0.000000e+00> : vector<8xf32>
    %46 = vector.multi_reduction <add>, %45, %cst_21 [1] : vector<8x128xf32> to vector<8xf32>
    %47 = vector.shape_cast %46 : vector<8xf32> to vector<8x1xf32>
    %cst_22 = arith.constant 3.125000e-02 : f32
    %48 = vector.broadcast %cst_22 : f32 to vector<8x1xf32>
    %49 = arith.mulf %47, %48 : vector<8x1xf32>
    %50 = vector.broadcast %49 : vector<8x1xf32> to vector<8x128xf32>
    %51 = arith.subf %45, %50 : vector<8x128xf32>
    %52 = tpu.iota {dimensions = array<i32: 1>} : vector<1x128xi32>
    %c32_i32 = arith.constant 32 : i32
    %53 = vector.broadcast %c32_i32 : i32 to vector<1x128xi32>
    %54 = arith.cmpi slt, %52, %53 : vector<1x128xi32>
    %cst_23 = arith.constant 0.000000e+00 : f32
    %55 = vector.shape_cast %54 : vector<1x128xi1> to vector<1x128xi1>
    %56 = vector.broadcast %55 : vector<1x128xi1> to vector<8x128xi1>
    %57 = vector.broadcast %cst_23 : f32 to vector<8x128xf32>
    %58 = arith.select %56, %51, %57 : vector<8x128xi1>, vector<8x128xf32>
    %59 = arith.mulf %58, %58 : vector<8x128xf32>
    %cst_24 = arith.constant dense<0.000000e+00> : vector<8xf32>
    %60 = vector.multi_reduction <add>, %59, %cst_24 [1] : vector<8x128xf32> to vector<8xf32>
    %61 = vector.shape_cast %60 : vector<8xf32> to vector<8x1xf32>
    %cst_25 = arith.constant 3.125000e-02 : f32
    %62 = vector.broadcast %cst_25 : f32 to vector<8x1xf32>
    %63 = arith.mulf %61, %62 : vector<8x1xf32>
    %cst_26 = arith.constant 9.99999974E-6 : f32
    %64 = vector.broadcast %cst_26 : f32 to vector<8x1xf32>
    %65 = arith.addf %63, %64 : vector<8x1xf32>
    %66 = math.rsqrt %65 : vector<8x1xf32>
    %67 = vector.broadcast %66 : vector<8x1xf32> to vector<8x128xf32>
    %68 = arith.mulf %51, %67 : vector<8x128xf32>
    %69 = vector.broadcast %8 : vector<1x128xf32> to vector<8x128xf32>
    %70 = arith.mulf %68, %69 : vector<8x128xf32>
    %71 = vector.broadcast %9 : vector<1x128xf32> to vector<8x128xf32>
    %72 = arith.addf %70, %71 : vector<8x128xf32>
    %cst_27 = arith.constant 0.000000e+00 : f32
    %73 = vector.broadcast %cst_27 : f32 to vector<8x128xf32>
    %74 = arith.maximumf %72, %73 : vector<8x128xf32>
    %cst_28 = arith.constant dense<0.000000e+00> : vector<8x128xf32>
    %75 = tpu.matmul %74, %3, %cst_28 {dimension_numbers = #tpu.dot_dimension_numbers<[1], [0], [0], [1], [0, 0, 1, 1], [], []>} : vector<8x128xf32>, vector<128x128xf32>, vector<8x128xf32> -> vector<8x128xf32>
    %76 = vector.broadcast %10 : vector<1x128xf32> to vector<8x128xf32>
    %77 = arith.addf %75, %76 : vector<8x128xf32>
    %78 = vector.extract_strided_slice %77 {offsets = [0, 0], sizes = [8, 4], strides = [1, 1]} : vector<8x128xf32> to vector<8x4xf32>
    %79 = math.tanh %78 : vector<8x4xf32>
    %c0_29 = arith.constant 0 : index
    %c0_30 = arith.constant 0 : index
    %80 = vector.load %arg4[%c0_29, %c0_30] : memref<8x4xf32, #tpu.memory_space<vmem>>, vector<8x4xf32>
    tpu.vector_store %arg4[%c0_29, %c0_30], %79 {strides = array<i32>} : memref<8x4xf32, #tpu.memory_space<vmem>>, vector<8x4xf32>,
    return
  }
  func.func @transform_0(%arg0: i32) -> (i32, i32) {
    %c0_i32 = arith.constant 0 : i32
    %c0_i32_0 = arith.constant 0 : i32
    return %arg0, %c0_i32 : i32, i32
  }
  func.func @transform_1(%arg0: i32) -> (i32, i32) {
    %c0_i32 = arith.constant 0 : i32
    %c0_i32_0 = arith.constant 0 : i32
    %c0_i32_1 = arith.constant 0 : i32
    return %c0_i32, %c0_i32_0 : i32, i32
  }
  func.func @transform_2(%arg0: i32) -> (i32, i32) {
    %c0_i32 = arith.constant 0 : i32
    %c0_i32_0 = arith.constant 0 : i32
    %c0_i32_1 = arith.constant 0 : i32
    return %c0_i32, %c0_i32_0 : i32, i32
  }
  func.func @transform_3(%arg0: i32) -> (i32, i32) {
    %c0_i32 = arith.constant 0 : i32
    %c0_i32_0 = arith.constant 0 : i32
    return %arg0, %c0_i32 : i32, i32
  }
}

</mosaic_0001>

<bundles_post_ra>
// kernel: forward.1
= control target key start
LH: loop header
LB: loop body
LE: loop exit
PB: predicated region body
PF: predicated region fallthrough
CT: control target
= control target key end

     0   :  { %8 = vsyncpa [#allocation3], 0  ;;  %s661_s0 = inlined_call_operand.hbm [shape: f32[8,16], index: 0, kind: input, shape index: {}]   ;;  %s662_s1 = inlined_call_operand.hbm [shape: f32[272,128], index: 1, kind: input, shape index: {}]   ;;  %s663_s2 = inlined_call_operand.hbm [shape: f32[8,128], index: 2, kind: input, shape index: {}]   ;;  %s664_s3 = inlined_call_operand.vmem [shape: f32[8,4], index: 3, kind: output, shape index: {}]  }
   0x1   :  { %9 = vsyncpa [#allocation5], 0  ;;  %s581_s12 = smov [#allocation4]  }
   0x2   :  { %s25_s13 = sshll.u32 %s581_s12, 4  ;;  %s26_s13 = int_to_ptr.vmem [resolvable:$true] %s25_s13 }
   0x3   :  { %s525_s14 = scalar_lea.vmem %s26_s13, 4352  ;;  %p530_p1 = scmp.lt.s32.totalorder %s26_s13, %s26_s13 }
   0x4   :  { %p526_p0 = scmp.ne.s32.totalorder %s26_s13, %s525_s14  ;;  %p531_p2 = scmp.lt.s32.totalorder %s525_s14, %s525_s14 }
   0x6   :  { %p532_p3 = por %p531_p2, %p530_p1 }
   0x8   :  { %p533_p4 = pnand %p532_p3, %p526_p0 }
   0xa   :  { %536 = shalt.err (!%p533_p4)
}
   0xb   :  { %s582_s15 = smov 128   ;;  %s583_s16 = smov 8  }
   0xc   :  { %31 = dma.hbm_to_vmem [thread:$0]  %s662_s1, 4352, %s26_s13, [#allocation5], %s582_s15, %s582_s15, %s583_s16  }
   0xd   :  { %s584_s19 = smov [#allocation2]   ;;  %s585_s21 = smov [#allocation6]  }
   0xe   :  { %s16_s20 = sshll.u32 %s584_s19, 4  ;;  %s38_s22 = sshll.u32 %s585_s21, 4  ;;  %s17_s20 = int_to_ptr.vmem [resolvable:$true] %s16_s20  ;;  %s39_s22 = int_to_ptr.vmem [resolvable:$true] %s38_s22 }
   0xf   :  { %s545_s23 = scalar_lea.vmem %s17_s20, 128  ;;  %p550_p6 = scmp.lt.s32.totalorder %s17_s20, %s17_s20 }
  0x10   :  { %p546_p5 = scmp.ne.s32.totalorder %s17_s20, %s545_s23  ;;  %p551_p7 = scmp.lt.s32.totalorder %s545_s23, %s545_s23 }
  0x12   :  { %p552_p8 = por %p551_p7, %p550_p6 }
  0x14   :  { %p553_p9 = pnand %p552_p8, %p546_p5 }
  0x16   :  { %556 = shalt.err (!%p553_p9)
}
  0x17   :  { %19 = dma.hbm_to_vmem [thread:$0]  %s661_s0, 128, %s17_s20, [#allocation3]  }
  0x18   :  { %s565_s26 = scalar_lea.vmem %s39_s22, 128  ;;  %p570_p11 = scmp.lt.s32.totalorder %s39_s22, %s39_s22 }
  0x19   :  { %p566_p10 = scmp.ne.s32.totalorder %s39_s22, %s565_s26  ;;  %p571_p12 = scmp.lt.s32.totalorder %s565_s26, %s565_s26 }
  0x1b   :  { %p572_p13 = por %p571_p12, %p570_p11 }
  0x1d   :  { %p573_p0 = pnand %p572_p13, %p566_p10 }
  0x1f   :  { %576 = shalt.err (!%p573_p0)
}
  0x20   :  { %41 = dma.hbm_to_vmem [thread:$0]  %s663_s2, 128, %s39_s22, [#allocation5]  }
  0x21   :  { %577 = dma.done.wait [#allocation3], 128  }
  0x22   :  { %578 = vsyncadd [#allocation3], 4294967168 }
  0x23   :  { %579 = dma.done.wait [#allocation5], 4480  }
  0x24   :  { %580 = vsyncadd [#allocation5], 4294962816  ;;  %v586_v0 = vmov 0.0   ;;  %vm587_vm0 = vmmov 0   ;;  %v53_v1 = vld [vmem:[#allocation4 + $0x8] sm:$0xff]  ;;  %v52_v2 = vld [vmem:[#allocation4] sm:$0xff]  ;;  %v175_v11 = vlaneseq }
  0x25   :  { %427 = vmatprep.subr.mxu0 %v586_v0  ;;  %431 = vmatprep.mubr.msk.f32.mxu0 %vm587_vm0, %v586_v0  ;;  %v51_v3 = vld [vmem:[#allocation2] sm:$0xff]  ;;  %vm97_vm1 = vcmask 130048   ;;  %v382_v4 = vld [vmem:[#allocation6] ss:$0 sm:$0xff]  ;;  %v69_v8 = vld [vmem:[#allocation4 + $0x88] sm:$0xff]  ;;  %vm374_vm4 = vcmask 31744  }
  0x26   :  { %434 = vmatprep.subr.mxu1 %v586_v0  ;;  %466 = vmatprep.mubr.msk.f32.mxu1 %vm587_vm0, %v586_v0  ;;  %v68_v9 = vld [vmem:[#allocation4 + $0x80] sm:$0xff]  ;;  %v67_v10 = vld [vmem:[#allocation4 + $0x78] sm:$0xff]  ;;  %v627_v12 = vand.u32 127, %v175_v11  ;;  %v66_v18 = vld [vmem:[#allocation4 + $0x70] sm:$0xff] }
  0x27   :  { %428 = vmatpush3.msra.mxu0 %v53_v1  ;;  %435 = vmatpush3.msra.mxu1 %v69_v8  ;;  %v65_v19 = vld [vmem:[#allocation4 + $0x68] sm:$0xff]  ;;  %v64_v20 = vld [vmem:[#allocation4 + $0x60] sm:$0xff]  ;;  %v63_v21 = vld [vmem:[#allocation4 + $0x58] sm:$0xff] }
  0x28   :  { %429 = vmatprep.subr.mxu0 %v586_v0  ;;  %436 = vmatprep.subr.mxu1 %v586_v0  ;;  %vm177_vm2 = vcmp.lt.s32.totalorder %v627_v12, 64  ;;  %v62_v22 = vld [vmem:[#allocation4 + $0x50] sm:$0xff]  ;;  %v61_v23 = vld [vmem:[#allocation4 + $0x48] sm:$0xff]  ;;  %v60_v24 = vld [vmem:[#allocation4 + $0x40] sm:$0xff]  ;;  %vm277_vm3 = vcmp.lt.s32.totalorder %v627_v12, 32 }
  0x29   :  { %430 = vmatpush3.msra.mxu0 %v52_v2  ;;  %437 = vmatpush3.msra.mxu1 %v68_v9  ;;  %v59_v25 = vld [vmem:[#allocation4 + $0x38] sm:$0xff]  ;;  %v58_v26 = vld [vmem:[#allocation4 + $0x30] sm:$0xff]  ;;  %v57_v27 = vld [vmem:[#allocation4 + $0x28] sm:$0xff] }
  0x2a   :  { %432 = vmatmul.mubr.msk.f32.vlgmr.msra.gmra.mxu0 %vm97_vm1, %v51_v3  ;;  %469 = vmatprep.subr.mxu0 %v586_v0  ;;  %v56_v28 = vld [vmem:[#allocation4 + $0x20] sm:$0xff]  ;;  %v55_v29 = vld [vmem:[#allocation4 + $0x18] sm:$0xff]  ;;  %v54_v30 = vld [vmem:[#allocation4 + $0x10] sm:$0xff] }
  0x2b   :  { %501 = vmatprep.mubr.msk.f32.mxu0 %vm587_vm0, %v586_v0  ;;  %438 = vmatprep.subr.mxu1 %v586_v0  ;;  %v384_v35 = vld [vmem:[#allocation6 + $0x1] ss:$0 sm:$0xff]  ;;  %v385_v37 = vld [vmem:[#allocation6 + $0x2] ss:$0 sm:$0xff]  ;;  %v386_v41 = vld [vmem:[#allocation6 + $0x3] ss:$0 sm:$0xff] }
  0x2c   :  { %439 = vmatpush3.msra.mxu1 %v67_v10  ;;  %v85_v45 = vld [vmem:[#allocation4 + $0x108] sm:$0xff]  ;;  %v84_v46 = vld [vmem:[#allocation4 + $0x100] sm:$0xff]  ;;  %v83_v47 = vld [vmem:[#allocation4 + $0xf8] sm:$0xff] }
  0x2d   :  { %440 = vmatprep.subr.mxu1 %v586_v0  ;;  %470 = vmatpush3.msra.mxu0 %v85_v45  ;;  %v82_v53 = vld [vmem:[#allocation4 + $0xf0] sm:$0xff]  ;;  %v81_v54 = vld [vmem:[#allocation4 + $0xe8] sm:$0xff]  ;;  %v80_v55 = vld [vmem:[#allocation4 + $0xe0] sm:$0xff] }
  0x2e   :  { %441 = vmatpush3.msra.mxu1 %v66_v18  ;;  %471 = vmatprep.subr.mxu0 %v586_v0  ;;  %v79_v56 = vld [vmem:[#allocation4 + $0xd8] sm:$0xff]  ;;  %v78_v57 = vld [vmem:[#allocation4 + $0xd0] sm:$0xff]  ;;  %v77_v58 = vld [vmem:[#allocation4 + $0xc8] sm:$0xff] }
  0x2f   :  { %442 = vmatprep.subr.mxu1 %v586_v0  ;;  %472 = vmatpush3.msra.mxu0 %v84_v46  ;;  %v76_v59 = vld [vmem:[#allocation4 + $0xc0] sm:$0xff]  ;;  %v75_v60 = vld [vmem:[#allocation4 + $0xb8] sm:$0xff]  ;;  %v74_v61 = vld [vmem:[#allocation4 + $0xb0] sm:$0xff] }
  0x30   :  { %443 = vmatpush3.msra.mxu1 %v65_v19  ;;  %473 = vmatprep.subr.mxu0 %v586_v0  ;;  %v73_v62 = vld [vmem:[#allocation4 + $0xa8] sm:$0xff]  ;;  %v72_v63 = vld [vmem:[#allocation4 + $0xa0] sm:$0xff]  ;;  %v71_v1 = vld [vmem:[#allocation4 + $0x98] sm:$0xff] }
  0x31   :  { %444 = vmatprep.subr.mxu1 %v586_v0  ;;  %474 = vmatpush3.msra.mxu0 %v83_v47  ;;  %v70_v2 = vld [vmem:[#allocation4 + $0x90] sm:$0xff] }
  0x32   :  { %445 = vmatpush3.msra.mxu1 %v64_v20  ;;  %475 = vmatprep.subr.mxu0 %v586_v0  ;;  %v388_v9 = vld [vmem:[#allocation6 + $0x5] ss:$0 sm:$0xff] }
  0x33   :  { %446 = vmatprep.subr.mxu1 %v586_v0  ;;  %476 = vmatpush3.msra.mxu0 %v82_v53 }
  0x34   :  { %447 = vmatpush3.msra.mxu1 %v63_v21  ;;  %477 = vmatprep.subr.mxu0 %v586_v0 }
  0x35   :  { %448 = vmatprep.subr.mxu1 %v586_v0  ;;  %478 = vmatpush3.msra.mxu0 %v81_v54 }
  0x36   :  { %449 = vmatpush3.msra.mxu1 %v62_v22  ;;  %479 = vmatprep.subr.mxu0 %v586_v0 }
  0x37   :  { %450 = vmatprep.subr.mxu1 %v586_v0  ;;  %480 = vmatpush3.msra.mxu0 %v80_v55 }
  0x38   :  { %451 = vmatpush3.msra.mxu1 %v61_v23  ;;  %481 = vmatprep.subr.mxu0 %v586_v0 }
  0x39   :  { %452 = vmatprep.subr.mxu1 %v586_v0  ;;  %482 = vmatpush3.msra.mxu0 %v79_v56 }
  0x3a   :  { %453 = vmatpush3.msra.mxu1 %v60_v24  ;;  %483 = vmatprep.subr.mxu0 %v586_v0 }
  0x3b   :  { %454 = vmatprep.subr.mxu1 %v586_v0  ;;  %484 = vmatpush3.msra.mxu0 %v78_v57 }
  0x3c   :  { %455 = vmatpush3.msra.mxu1 %v59_v25  ;;  %485 = vmatprep.subr.mxu0 %v586_v0 }
  0x3d   :  { %456 = vmatprep.subr.mxu1 %v586_v0  ;;  %486 = vmatpush3.msra.mxu0 %v77_v58 }
  0x3e   :  { %457 = vmatpush3.msra.mxu1 %v58_v26  ;;  %487 = vmatprep.subr.mxu0 %v586_v0 }
  0x3f   :  { %458 = vmatprep.subr.mxu1 %v586_v0  ;;  %488 = vmatpush3.msra.mxu0 %v76_v59 }
  0x40   :  { %459 = vmatpush3.msra.mxu1 %v57_v27  ;;  %489 = vmatprep.subr.mxu0 %v586_v0 }
  0x41   :  { %460 = vmatprep.subr.mxu1 %v586_v0  ;;  %490 = vmatpush3.msra.mxu0 %v75_v60 }
  0x42   :  { %461 = vmatpush3.msra.mxu1 %v56_v28  ;;  %491 = vmatprep.subr.mxu0 %v586_v0 }
  0x43   :  { %462 = vmatprep.subr.mxu1 %v586_v0  ;;  %492 = vmatpush3.msra.mxu0 %v74_v61 }
  0x44   :  { %463 = vmatpush3.msra.mxu1 %v55_v29  ;;  %493 = vmatprep.subr.mxu0 %v586_v0 }
  0x45   :  { %464 = vmatprep.subr.mxu1 %v586_v0  ;;  %494 = vmatpush3.msra.mxu0 %v73_v62 }
  0x46   :  { %465 = vmatpush3.msra.mxu1 %v54_v30  ;;  %495 = vmatprep.subr.mxu0 %v586_v0 }
  0x47   :  { %496 = vmatpush3.msra.mxu0 %v72_v63 }
  0x48   :  { %497 = vmatprep.subr.mxu0 %v586_v0 }
  0x49   :  { %498 = vmatpush3.msra.mxu0 %v71_v1 }
  0x4a   :  { %499 = vmatprep.subr.mxu0 %v586_v0 }
  0x4b   :  { %500 = vmatpush3.msra.mxu0 %v70_v2 }
  0xea   :  { %v167_v5 = vpop.f32.mrf.mxu0 }
  0xeb   :  { %v168_v6 = vadd.f32 %v382_v4, %v167_v5 }
  0xec   :  { %v433_v7 = vpop.f32.mrf.mxu0 }
  0xed   :  { %171 = vadd.xlane.f32.xlu0 %v168_v6  ;;  %v387_v7 = vld [vmem:[#allocation6 + $0x4] ss:$0 sm:$0xff] }
 0x176   :  { %v172_v13 = vpop.xlane.xlu0 %171 }
 0x177   :  { %v173_v14 = vmul.f32 0.015625, %v172_v13  ;;  %v389_v13 = vld [vmem:[#allocation6 + $0x6] ss:$0 sm:$0xff] }
 0x179   :  { %v174_v15 = vsub.f32 %v168_v6, %v173_v14 }
 0x17b   :  { %v180_v16 = vsel %vm177_vm2, %v174_v15, 0.0 }
 0x17c   :  { %v181_v17 = vmul.f32 %v180_v16, %v180_v16 }
 0x17e   :  { %182 = vadd.xlane.f32.xlu0 %v181_v17 }
 0x207   :  { %v183_v31 = vpop.xlane.xlu0 %182 }
 0x208   :  { %v184_v32 = vmul.f32 0.015625, %v183_v31 }
 0x20a   :  { %v185_v33 = vadd.f32 1e-05, %v184_v32 }
 0x20c   :  { %511 = vrsqrt.f32 %v185_v33 }
 0x219   :  { %v512_v34 = vpop.eup %511 }
 0x21a   :  { %v187_v36 = vmul.f32 %v512_v34, %v174_v15 }
 0x21c   :  { %v192_v38 = vmul.f32 %v384_v35, %v187_v36 }
 0x21e   :  { %v197_v39 = vadd.f32 %v385_v37, %v192_v38 }
 0x220   :  { %v198_v40 = vmax.f32 %v197_v39, 0.0 }
 0x222   :  { %467 = vmatmul.mubr.f32.vlgmr.msra.gmra.mxu1 %v198_v40 }
 0x2e2   :  { %v269_v42 = vpop.f32.mrf.mxu1 }
 0x2e3   :  { %v270_v43 = vadd.f32 %v386_v41, %v269_v42 }
 0x2e4   :  { %v468_v44 = vpop.f32.mrf.mxu1 }
 0x2e5   :  { %273 = vadd.xlane.f32.xlu1 %v270_v43 }
 0x36e   :  { %v274_v48 = vpop.xlane.xlu1 %273 }
 0x36f   :  { %v275_v49 = vmul.f32 0.03125, %v274_v48 }
 0x371   :  { %v276_v50 = vsub.f32 %v270_v43, %v275_v49 }
 0x373   :  { %v280_v51 = vsel %vm277_vm3, %v276_v50, 0.0 }
 0x374   :  { %v281_v52 = vmul.f32 %v280_v51, %v280_v51 }
 0x376   :  { %282 = vadd.xlane.f32.xlu1 %v281_v52 }
 0x3ff   :  { %v283_v3 = vpop.xlane.xlu1 %282 }
 0x400   :  { %v284_v4 = vmul.f32 0.03125, %v283_v3 }
 0x402   :  { %v285_v5 = vadd.f32 1e-05, %v284_v4 }
 0x404   :  { %513 = vrsqrt.f32 %v285_v5 }
 0x411   :  { %v514_v6 = vpop.eup %513 }
 0x412   :  { %v287_v8 = vmul.f32 %v514_v6, %v276_v50 }
 0x414   :  { %v292_v10 = vmul.f32 %v387_v7, %v287_v8 }
 0x416   :  { %v297_v11 = vadd.f32 %v388_v9, %v292_v10 }
 0x418   :  { %v298_v12 = vmax.f32 %v297_v11, 0.0 }
 0x41a   :  { %502 = vmatmul.mubr.f32.vlgmr.msra.gmra.mxu0 %v298_v12 }
 0x4da   :  { %v369_v14 = vpop.f32.mrf.mxu0 }
 0x4db   :  { %v370_v15 = vadd.f32 %v389_v13, %v369_v14 }
 0x4dc   :  { %v503_v16 = vpop.f32.mrf.mxu0 }
 0x4dd   :  { %515 = vtanh.f32 %v370_v15 }
 0x4ea   :  { %v516_v0 = vpop.eup %515 }
 0x4eb   :  { %375 = vst.msk [vmem:[%s664_s3] sm:$0xff] %vm374_vm4, %v516_v0 }
 0x4ec   :  { %380 = vsyncpa [#allocation3], 1 }
 0x4ed   :  { %381 = vsyncpa [#allocation5], 1 }

</bundles_post_ra>
